<compile_context>
chip_gen: v7x
topology: tpu7x:2x2x1
jax: 0.10.0
libtpu: 0.0.40
codegen_flags: <defaults>
</compile_context>

<pallas_src>
import functools

import jax
import jax.numpy as jnp
from jax.experimental import pallas as pl
from jax.experimental.pallas import tpu as pltpu

D_IN = 784
H1, H1_PAD = 300, 384      # 3 * 128
H2, H2_PAD = 100, 128
D_OUT, OUT_PAD = 10, 128


def _ceil_div(a, b):
    return -(-a // b)


def _round_up(x, m):
    return _ceil_div(x, m) * m


def mlp_kernel(x_ref, w1_ref, b1_ref, w2_ref, b2_ref, w3_ref, b3_ref, o_ref):
    """Whole 3-layer MLP for one batch tile, fused in a single kernel body."""
    # x arrives in the caller's dtype (f32); cast to bf16 in-register for the MXU.
    x = x_ref[...].astype(jnp.bfloat16)

    # fc1: (tb, 784) @ (784, 384) + (1, 384) -> relu  (f32 accumulate)
    h1 = jnp.dot(x, w1_ref[...], preferred_element_type=jnp.float32)
    h1 = jnp.maximum(h1 + b1_ref[...], 0.0)

    # fc2: (tb, 384) @ (384, 128) + (1, 128) -> relu
    h2 = jnp.dot(h1.astype(jnp.bfloat16), w2_ref[...],
                 preferred_element_type=jnp.float32)
    h2 = jnp.maximum(h2 + b2_ref[...], 0.0)

    # fc3: (tb, 128) @ (128, 128) + (1, 128)   (no activation); store bf16.
    o_ref[...] = (
        jnp.dot(h2.astype(jnp.bfloat16), w3_ref[...],
                preferred_element_type=jnp.float32) + b3_ref[...]
    ).astype(o_ref.dtype)


def prepare_params(params):
    """One-time pack: zero-pad layer output dims to multiples of 128 and cast
    weights to bf16. Call once (outside the per-step forward path) and reuse.

    Padded rows/columns are zero, so the math is unchanged.
    """
    w1 = jnp.pad(params["w1"], ((0, 0), (0, H1_PAD - H1))).astype(jnp.bfloat16)
    b1 = jnp.pad(params["b1"], (0, H1_PAD - H1)).reshape(1, -1).astype(jnp.float32)
    w2 = jnp.pad(params["w2"], ((0, H1_PAD - H1), (0, H2_PAD - H2))).astype(jnp.bfloat16)
    b2 = jnp.pad(params["b2"], (0, H2_PAD - H2)).reshape(1, -1).astype(jnp.float32)
    w3 = jnp.pad(params["w3"], ((0, H2_PAD - H2), (0, OUT_PAD - D_OUT))).astype(jnp.bfloat16)
    b3 = jnp.pad(params["b3"], (0, OUT_PAD - D_OUT)).reshape(1, -1).astype(jnp.float32)
    return dict(w1=w1, b1=b1, w2=w2, b2=b2, w3=w3, b3=b3)


@functools.partial(jax.jit, static_argnames=("block_b",))
def classification_net_forward(x, packed, *, block_b=512):
    """Forward pass of ClassificationNet.

    x:      (B, 784) float32
    packed: output of prepare_params (padded bf16 weights, padded f32 biases)
    returns: (B, 10) float32 logits
    """
    B, d_in = x.shape
    assert d_in == D_IN

    # --- batch tiling ---------------------------------------------------
    # n_steps tiles of tile_b rows each; padding bounded to <=15 rows per tile.
    n_steps = max(1, _ceil_div(B, block_b))
    if n_steps == 1 and B >= 32:
        # Keep >=2 evenly sized grid steps so v7x's two TensorCores both run;
        # costs one extra (~0.35us) grid step on single-TC v5e/v6e.
        n_steps = 2
    tile_b = _round_up(_ceil_div(B, n_steps), 16)   # 16-row groups: bf16 sublane packing
    B_pad = n_steps * tile_b
    if B_pad != B:
        x = jnp.pad(x, ((0, B_pad - B), (0, 0)))

    grid = (n_steps,)

    # Weights/biases are replicated to every grid step (constant block index,
    # so Pallas does not re-DMA them between consecutive steps); only the batch
    # dimension of x / out is tiled.
    rep2d = lambda i: (0, 0)

    flops = 2 * B_pad * (D_IN * H1_PAD + H1_PAD * H2_PAD + H2_PAD * OUT_PAD)
    bytes_accessed = (
        B_pad * D_IN * 4                                             # x (f32)
        + (D_IN * H1_PAD + H1_PAD * H2_PAD + H2_PAD * OUT_PAD) * 2   # weights (bf16)
        + (H1_PAD + H2_PAD + OUT_PAD) * 4                            # biases (f32)
        + B_pad * OUT_PAD * 2                                        # output (bf16)
    )

    out = pl.pallas_call(
        mlp_kernel,
        out_shape=jax.ShapeDtypeStruct((B_pad, OUT_PAD), jnp.bfloat16),
        grid_spec=pl.GridSpec(
            grid=grid,
            in_specs=[
                pl.BlockSpec((tile_b, D_IN), lambda i: (i, 0)),     # x tile
                pl.BlockSpec((D_IN, H1_PAD), rep2d),                # w1
                pl.BlockSpec((1, H1_PAD), rep2d),                   # b1
                pl.BlockSpec((H1_PAD, H2_PAD), rep2d),              # w2
                pl.BlockSpec((1, H2_PAD), rep2d),                   # b2
                pl.BlockSpec((H2_PAD, OUT_PAD), rep2d),             # w3
                pl.BlockSpec((1, OUT_PAD), rep2d),                  # b3
            ],
            out_specs=pl.BlockSpec((tile_b, OUT_PAD), lambda i: (i, 0)),
        ),
        compiler_params=pltpu.CompilerParams(
            dimension_semantics=("parallel",),
        ),
        cost_estimate=pl.CostEstimate(
            flops=flops, transcendentals=0, bytes_accessed=bytes_accessed
        ),
    )(x, packed["w1"], packed["b1"], packed["w2"], packed["b2"],
      packed["w3"], packed["b3"])

    # Slice away batch padding and the 10->128 lane padding; return f32 logits.
    return out[:B, :D_OUT].astype(jnp.float32)


def init_params(key):
    """Deterministic init mimicking PyTorch nn.Linear default (U[-1/sqrt(in), 1/sqrt(in)]).

    Weights are stored transposed relative to PyTorch ((in, out) instead of
    (out, in)) so the kernel can compute x @ W directly.
    """
    dims = [(D_IN, H1), (H1, H2), (H2, D_OUT)]
    params = {}
    keys = jax.random.split(key, 2 * len(dims))
    for idx, (d_in, d_out) in enumerate(dims):
        bound = 1.0 / jnp.sqrt(d_in)
        w = jax.random.uniform(keys[2 * idx], (d_in, d_out), jnp.float32, -bound, bound)
        b = jax.random.uniform(keys[2 * idx + 1], (d_out,), jnp.float32, -bound, bound)
        params[f"w{idx + 1}"] = w
        params[f"b{idx + 1}"] = b
    return params


def reference_forward(x, params):
    """Plain-JAX f32 reference for correctness check."""
    h = jnp.maximum(x @ params["w1"] + params["b1"], 0.0)
    h = jnp.maximum(h @ params["w2"] + params["b2"], 0.0)
    return h @ params["w3"] + params["b3"]


if __name__ == "__main__":
    key = jax.random.PRNGKey(0)
    pkey, xkey = jax.random.split(key)

    params = init_params(pkey)
    packed = jax.block_until_ready(prepare_params(params))   # one-time weight prep

    batch = 32
    x = jax.random.normal(xkey, (batch, D_IN), jnp.float32)

    out = classification_net_forward(x, packed)
    out = jax.block_until_ready(out)

    ref = reference_forward(x, params)
    assert out.shape == (batch, D_OUT), out.shape
    # bf16 MXU operands with f32 accumulation + bf16 logit store: ~1e-2 rel error.
    assert jnp.allclose(out, ref, atol=5e-2, rtol=5e-2), "mismatch vs reference"

    print("KERNEL_OK")
</pallas_src>

<mosaic_0001>
module attributes {stable_mosaic.version = 11 : i64} {
  func.func @mlp_kernel(%arg0: i32, %arg1: memref<16x784xf32, #tpu.memory_space<vmem>>, %arg2: memref<784x384xbf16, #tpu.memory_space<vmem>>, %arg3: memref<1x384xf32, #tpu.memory_space<vmem>>, %arg4: memref<384x128xbf16, #tpu.memory_space<vmem>>, %arg5: memref<1x128xf32, #tpu.memory_space<vmem>>, %arg6: memref<128x128xbf16, #tpu.memory_space<vmem>>, %arg7: memref<1x128xf32, #tpu.memory_space<vmem>>, %arg8: memref<16x128xbf16, #tpu.memory_space<vmem>>) attributes {dimension_semantics = [#tpu.dimension_semantics<parallel>], iteration_bounds = array<i64: 2>, scalar_prefetch = 0 : i64, scratch_operands = 0 : i64, tpu.core_type = #tpu.core_type<tc>, window_params = [{transform_indices = @transform_0, window_bounds = array<i64: 16, 784>}, {pipeline_mode = #tpu.pipeline_mode<synchronous>, transform_indices = @transform_1, window_bounds = array<i64: 784, 384>}, {pipeline_mode = #tpu.pipeline_mode<synchronous>, transform_indices = @transform_2, window_bounds = array<i64: 1, 384>}, {pipeline_mode = #tpu.pipeline_mode<synchronous>, transform_indices = @transform_3, window_bounds = array<i64: 384, 128>}, {pipeline_mode = #tpu.pipeline_mode<synchronous>, transform_indices = @transform_4, window_bounds = array<i64: 1, 128>}, {pipeline_mode = #tpu.pipeline_mode<synchronous>, transform_indices = @transform_5, window_bounds = array<i64: 128, 128>}, {pipeline_mode = #tpu.pipeline_mode<synchronous>, transform_indices = @transform_6, window_bounds = array<i64: 1, 128>}, {transform_indices = @transform_7, window_bounds = array<i64: 16, 128>}]} {
    %c0 = arith.constant 0 : index
    %c0_0 = arith.constant 0 : index
    %0 = vector.load %arg1[%c0, %c0_0] : memref<16x784xf32, #tpu.memory_space<vmem>>, vector<16x784xf32>
    %1 = arith.truncf %0 : vector<16x784xf32> to vector<16x784xbf16>
    %c0_1 = arith.constant 0 : index
    %c0_2 = arith.constant 0 : index
    %2 = vector.load %arg2[%c0_1, %c0_2] : memref<784x384xbf16, #tpu.memory_space<vmem>>, vector<784x384xbf16>
    %cst = arith.constant dense<0.000000e+00> : vector<16x384xf32>
    %3 = tpu.matmul %1, %2, %cst {dimension_numbers = #tpu.dot_dimension_numbers<[1], [0], [0], [1], [0, 0, 1, 1], [], []>} : vector<16x784xbf16>, vector<784x384xbf16>, vector<16x384xf32> -> vector<16x384xf32>
    %c0_3 = arith.constant 0 : index
    %c0_4 = arith.constant 0 : index
    %4 = vector.load %arg3[%c0_3, %c0_4] : memref<1x384xf32, #tpu.memory_space<vmem>>, vector<1x384xf32>
    %5 = vector.broadcast %4 : vector<1x384xf32> to vector<16x384xf32>
    %6 = arith.addf %3, %5 : vector<16x384xf32>
    %cst_5 = arith.constant 0.000000e+00 : f32
    %7 = vector.broadcast %cst_5 : f32 to vector<16x384xf32>
    %8 = arith.maximumf %6, %7 : vector<16x384xf32>
    %9 = arith.truncf %8 : vector<16x384xf32> to vector<16x384xbf16>
    %c0_6 = arith.constant 0 : index
    %c0_7 = arith.constant 0 : index
    %10 = vector.load %arg4[%c0_6, %c0_7] : memref<384x128xbf16, #tpu.memory_space<vmem>>, vector<384x128xbf16>
    %cst_8 = arith.constant dense<0.000000e+00> : vector<16x128xf32>
    %11 = tpu.matmul %9, %10, %cst_8 {dimension_numbers = #tpu.dot_dimension_numbers<[1], [0], [0], [1], [0, 0, 1, 1], [], []>} : vector<16x384xbf16>, vector<384x128xbf16>, vector<16x128xf32> -> vector<16x128xf32>
    %c0_9 = arith.constant 0 : index
    %c0_10 = arith.constant 0 : index
    %12 = vector.load %arg5[%c0_9, %c0_10] : memref<1x128xf32, #tpu.memory_space<vmem>>, vector<1x128xf32>
    %13 = vector.broadcast %12 : vector<1x128xf32> to vector<16x128xf32>
    %14 = arith.addf %11, %13 : vector<16x128xf32>
    %cst_11 = arith.constant 0.000000e+00 : f32
    %15 = vector.broadcast %cst_11 : f32 to vector<16x128xf32>
    %16 = arith.maximumf %14, %15 : vector<16x128xf32>
    %17 = arith.truncf %16 : vector<16x128xf32> to vector<16x128xbf16>
    %c0_12 = arith.constant 0 : index
    %c0_13 = arith.constant 0 : index
    %18 = vector.load %arg6[%c0_12, %c0_13] : memref<128x128xbf16, #tpu.memory_space<vmem>>, vector<128x128xbf16>
    %cst_14 = arith.constant dense<0.000000e+00> : vector<16x128xf32>
    %19 = tpu.matmul %17, %18, %cst_14 {dimension_numbers = #tpu.dot_dimension_numbers<[1], [0], [0], [1], [0, 0, 1, 1], [], []>} : vector<16x128xbf16>, vector<128x128xbf16>, vector<16x128xf32> -> vector<16x128xf32>
    %c0_15 = arith.constant 0 : index
    %c0_16 = arith.constant 0 : index
    %20 = vector.load %arg7[%c0_15, %c0_16] : memref<1x128xf32, #tpu.memory_space<vmem>>, vector<1x128xf32>
    %21 = vector.broadcast %20 : vector<1x128xf32> to vector<16x128xf32>
    %22 = arith.addf %19, %21 : vector<16x128xf32>
    %23 = arith.truncf %22 : vector<16x128xf32> to vector<16x128xbf16>
    %c0_17 = arith.constant 0 : index
    %c0_18 = arith.constant 0 : index
    %24 = vector.load %arg8[%c0_17, %c0_18] : memref<16x128xbf16, #tpu.memory_space<vmem>>, vector<16x128xbf16>
    tpu.vector_store %arg8[%c0_17, %c0_18], %23 {strides = array<i32>} : memref<16x128xbf16, #tpu.memory_space<vmem>>, vector<16x128xbf16>,
    return
  }
  func.func @transform_0(%arg0: i32) -> (i32, i32) {
    %c0_i32 = arith.constant 0 : i32
    %c0_i32_0 = arith.constant 0 : i32
    return %arg0, %c0_i32 : i32, i32
  }
  func.func @transform_1(%arg0: i32) -> (i32, i32) {
    %c0_i32 = arith.constant 0 : i32
    %c0_i32_0 = arith.constant 0 : i32
    %c0_i32_1 = arith.constant 0 : i32
    return %c0_i32, %c0_i32_0 : i32, i32
  }
  func.func @transform_2(%arg0: i32) -> (i32, i32) {
    %c0_i32 = arith.constant 0 : i32
    %c0_i32_0 = arith.constant 0 : i32
    %c0_i32_1 = arith.constant 0 : i32
    return %c0_i32, %c0_i32_0 : i32, i32
  }
  func.func @transform_3(%arg0: i32) -> (i32, i32) {
    %c0_i32 = arith.constant 0 : i32
    %c0_i32_0 = arith.constant 0 : i32
    %c0_i32_1 = arith.constant 0 : i32
    return %c0_i32, %c0_i32_0 : i32, i32
  }
  func.func @transform_4(%arg0: i32) -> (i32, i32) {
    %c0_i32 = arith.constant 0 : i32
    %c0_i32_0 = arith.constant 0 : i32
    %c0_i32_1 = arith.constant 0 : i32
    return %c0_i32, %c0_i32_0 : i32, i32
  }
  func.func @transform_5(%arg0: i32) -> (i32, i32) {
    %c0_i32 = arith.constant 0 : i32
    %c0_i32_0 = arith.constant 0 : i32
    %c0_i32_1 = arith.constant 0 : i32
    return %c0_i32, %c0_i32_0 : i32, i32
  }
  func.func @transform_6(%arg0: i32) -> (i32, i32) {
    %c0_i32 = arith.constant 0 : i32
    %c0_i32_0 = arith.constant 0 : i32
    %c0_i32_1 = arith.constant 0 : i32
    return %c0_i32, %c0_i32_0 : i32, i32
  }
  func.func @transform_7(%arg0: i32) -> (i32, i32) {
    %c0_i32 = arith.constant 0 : i32
    %c0_i32_0 = arith.constant 0 : i32
    return %arg0, %c0_i32 : i32, i32
  }
}

</mosaic_0001>

<bundles_post_ra>
// kernel: classification_net_forward.1
= control target key start
LH: loop header
LB: loop body
LE: loop exit
PB: predicated region body
PF: predicated region fallthrough
CT: control target
= control target key end

     0   :  { %12 = vsyncpa [#allocation3], 0  ;;  %s3379_s0 = inlined_call_operand.hbm [shape: f32[32,784], index: 0, kind: input, shape index: {}]   ;;  %s3380_s1 = inlined_call_operand.hbm [shape: bf16[784,384], index: 1, kind: input, shape index: {}]   ;;  %s3381_s2 = inlined_call_operand.vmem [shape: f32[1,384], index: 2, kind: input, shape index: {}]   ;;  %s3382_s3 = inlined_call_operand.hbm [shape: bf16[384,128], index: 3, kind: input, shape index: {}]   ;;  %s3383_s4 = inlined_call_operand.vmem [shape: f32[1,128], index: 4, kind: input, shape index: {}]   ;;  %s3384_s5 = inlined_call_operand.hbm [shape: bf16[128,128], index: 5, kind: input, shape index: {}]   ;;  %s3385_s6 = inlined_call_operand.vmem [shape: f32[1,128], index: 6, kind: input, shape index: {}]   ;;  %s3386_s7 = inlined_call_operand.vmem [shape: bf16[32,128], index: 7, kind: output, shape index: {}]  }
   0x1   :  { %14 = vsyncpa [#allocation3 + $0x1], 0 }
   0x2   :  { %15 = vsyncpa [#allocation5], 0 }
   0x3   :  { %16 = vsyncpa [#allocation8], 0  ;;  %s3117_s24 = smov 0   ;;  %s3119_s25 = smov 0  }
   0x4   :  { %s3121_s26 = smov 0   ;;  %s3123_s27 = smov 0  }
   0x5 LB: > { %s3391_s28 = sadd.s32 4294967295, %s3062_s27   ;;  %p42_p0 = scmp.ne.s32.totalorder %s3054_s25, %s3050_s24  ;;  %s3062_s27 = sphi %s3123_s27, %s3405_s27   ;;  %s3058_s26 = sphi %s3121_s26, %s3404_s26   ;;  %s3054_s25 = sphi %s3119_s25, %s3403_s25   ;;  %s3050_s24 = sphi %s3117_s24, %s3402_s24  }
   0x6   : > { %p3139_p1 = scmp.eq.s32.totalorder %s3391_s28, 0  ;;  %p2218_p2 = scmp.ge.s32.totalorder %s3062_s27, 1 }
   0x7   : > { %p205_p3 = scmp.lt.s32.totalorder %s3062_s27, 3  ;;  %s3064_s9 = smov [#allocation4]  }
   0x8   : > { %s3392_s29 = scalar_select %p3139_p1, 1, 0 }
   0x9   : > { %p3147_p4 = por %p3139_p1, %p42_p0  ;;  %p3151_p5 = pnand %p2218_p2, %p205_p3 }
   0xa   : > { %s217_s10 = sshll.u32 %s3064_s9, 4  ;;  %s3065_s12 = smov [#allocation6]   ;;  %s218_s10 = int_to_ptr.vmem [resolvable:$true] %s217_s10 }
   0xb   : > { %s3393_s30 = scalar_select %p3147_p4, 1, 0 }
   0xc   : > { %s3394_s8 = scalar_select %p3151_p5, 1, 0 }
   0xd   : > { %p2613_p6 = pneg %p3151_p5  ;;  %s233_s13 = sshll.u32 %s3065_s12, 4  ;;  %s3163_s13 = int_to_ptr.vmem [resolvable:$true] %s233_s13 }
   0xe   : > { %s2906_s16 = scalar_lea.hbm %s3380_s1, 18816 }
   0xf   : > { %p3159_p7 = pnand %p2613_p6, %p3139_p1  ;;  %p2907_p8 = scmp.ne.s32.totalorder %s3380_s1, %s2906_s16 }
  0x10   : > { %p2913_p12 = scmp.lt.u32.totalorder %s2906_s16, %s3380_s1 }
  0x11   : > { %p3173_p9 = pneg %p3159_p7 }
  0x13   : > { %p2909_p10 = pnand %p3173_p9, %p2907_p8 }
  0x15   : > { %p2910_p11 = pneg %p2909_p10 }
  0x17   : > { %p2915_p13 = pnand %p2913_p12, %p2910_p11 }
  0x19   : > { %2918 = shalt.err (!%p2915_p13)
}
  0x1a   : > { %s2919_s22 = scalar_lea.vmem %s218_s10, 18816  ;;  %p2927_p6 = scmp.lt.s32.totalorder %s218_s10, %s218_s10 }
  0x1b   : > { %p2920_p0 = scmp.ne.s32.totalorder %s218_s10, %s2919_s22  ;;  %p2928_p1 = scmp.lt.s32.totalorder %s2919_s22, %s2919_s22 }
  0x1d   : > { %p2922_p2 = pnand %p2920_p0, %p3173_p9  ;;  %p2929_p4 = por %p2928_p1, %p2927_p6 }
  0x1f   : > { %p2923_p3 = pneg %p2922_p2 }
  0x21   : > { %p2930_p5 = pnand %p2929_p4, %p2923_p3 }
  0x23   : > { %2933 = shalt.err (!%p2930_p5)
}
  0x24   : > { %s3066_s23 = smov 192   ;;  %s3067_s24 = smov 12  }
  0x25   : > { %2616 = dma.hbm_to_vmem [thread:$0]  (!%p3159_p7), %s3380_s1, 18816, %s218_s10, [#allocation5], %s3066_s23, %s3066_s23, %s3067_s24  }
  0x26   : > { %s2934_s16 = scalar_lea.hbm %s3382_s3, 3072 }
  0x27   : > { %p2935_p8 = scmp.ne.s32.totalorder %s3382_s3, %s2934_s16  ;;  %p2941_p5 = scmp.lt.u32.totalorder %s2934_s16, %s3382_s3 }
  0x29   : > { %p2937_p1 = pnand %p2935_p8, %p3173_p9 }
  0x2b   : > { %p2938_p4 = pneg %p2937_p1 }
  0x2d   : > { %p2943_p10 = pnand %p2941_p5, %p2938_p4 }
  0x2f   : > { %2946 = shalt.err (!%p2943_p10)
}
  0x30   : > { %s2947_s10 = scalar_lea.vmem %s3163_s13, 3072  ;;  %p2955_p0 = scmp.lt.s32.totalorder %s3163_s13, %s3163_s13 }
  0x31   : > { %p2948_p11 = scmp.ne.s32.totalorder %s3163_s13, %s2947_s10  ;;  %p2956_p2 = scmp.lt.s32.totalorder %s2947_s10, %s2947_s10 }
  0x33   : > { %p2950_p12 = pnand %p2948_p11, %p3173_p9  ;;  %p2957_p3 = por %p2956_p2, %p2955_p0 }
  0x35   : > { %p2951_p13 = pneg %p2950_p12 }
  0x37   : > { %p2958_p6 = pnand %p2957_p3, %p2951_p13 }
  0x39   : > { %2961 = shalt.err (!%p2958_p6)
}
  0x3a   : > { %s3068_s22 = smov 64   ;;  %s3069_s23 = smov 4  }
  0x3b   : > { %2619 = dma.hbm_to_vmem [thread:$0]  (!%p3159_p7), %s3382_s3, 3072, %s3163_s13, [#allocation5], %s3068_s22, %s3068_s22, %s3069_s23  }
  0x3c   : > { %s3070_s12 = smov [#allocation7]   ;;  %s3213_s15 = sadd.s32 1, %s3062_s27  }
  0x3d   : > { %s249_s14 = sshll.u32 %s3070_s12, 4  ;;  %s2962_s18 = scalar_lea.hbm %s3384_s5, 1024  ;;  %s250_s14 = int_to_ptr.vmem [resolvable:$true] %s249_s14 }
  0x3e   : > { %p2963_p8 = scmp.ne.s32.totalorder %s3384_s5, %s2962_s18  ;;  %p2969_p5 = scmp.lt.u32.totalorder %s2962_s18, %s3384_s5 }
  0x40   : > { %p2965_p1 = pnand %p2963_p8, %p3173_p9 }
  0x42   : > { %p2966_p4 = pneg %p2965_p1 }
  0x44   : > { %p2971_p10 = pnand %p2969_p5, %p2966_p4 }
  0x46   : > { %2974 = shalt.err (!%p2971_p10)
}
  0x47   : > { %s2975_s13 = scalar_lea.vmem %s250_s14, 1024  ;;  %p2983_p0 = scmp.lt.s32.totalorder %s250_s14, %s250_s14 }
  0x48   : > { %p2976_p11 = scmp.ne.s32.totalorder %s250_s14, %s2975_s13  ;;  %p2984_p2 = scmp.lt.s32.totalorder %s2975_s13, %s2975_s13 }
  0x4a   : > { %p2978_p12 = pnand %p2976_p11, %p3173_p9  ;;  %p2985_p3 = por %p2984_p2, %p2983_p0 }
  0x4c   : > { %p2979_p13 = pneg %p2978_p12 }
  0x4e   : > { %p2986_p6 = pnand %p2985_p3, %p2979_p13 }
  0x50   : > { %2989 = shalt.err (!%p2986_p6)
}
  0x51   : > { %2622 = dma.hbm_to_vmem [thread:$0]  (!%p3159_p7), %s3384_s5, 1024, %s250_s14, [#allocation8], %s3068_s22, %s3068_s22, %s3069_s23  }
  0x52   : > { %s26_s28 = ssub.s32 %s3062_s27, %s3213_s15  ;;  %s29_s19 = sadd.s32 1, %s3058_s26 }
  0x53   : > { %p27_p9 = scmp.eq.s32.totalorder %s26_s28, 0  ;;  %p36_p8 = scmp.ne.s32.totalorder %s3058_s26, %s3054_s25 }
  0x54   : > { %p37_p1 = scmp.eq.s32.totalorder %s3062_s27, 0  ;;  %p2630_p4 = scmp.lt.s32.totalorder %s3062_s27, 2 }
  0x55   : > { %s3241_s11 = scalar_select %p27_p9, %s3058_s26, %s29_s19  }
  0x56   : > { %p38_p5 = por %p37_p1, %p36_p8  ;;  %s266_s12 = sand.u32 1, %s3058_s26  }
  0x57   : > { %s2596_s16 = smul.u32 112, %s266_s12  ;;  %s3256_s10 = scalar_lea.sflag [#allocation3], %s266_s12 }
  0x58   : > { %s2597_s17 = smul.u32 1792, %s3062_s27  ;;  %p3245_p10 = pnand %p2630_p4, %p38_p5 }
  0x59   : > { %s270_s23 = scalar_lea.vmem [#allocation2], %s2596_s16  ;;  %s2995_s28 = scalar_lea.hbm %s3379_s0, 3584 }
  0x5a   : > { %s3252_s22 = scalar_lea.hbm %s3379_s0, %s2597_s17  ;;  %s278_s14 = sshll.u32 %s270_s23, 4  ;;  %s3254_s14 = int_to_ptr.vmem [resolvable:$true] %s278_s14 }
  0x5b   : > { %s2990_s13 = scalar_lea.hbm %s3252_s22, 1792  ;;  %p2992_p11 = pneg %p3245_p10 }
  0x5c   : > { %p2991_p7 = scmp.ne.s32.totalorder %s3252_s22, %s2990_s13  ;;  %p2996_p0 = scmp.lt.u32.totalorder %s3252_s22, %s3379_s0 }
  0x5d   : > { %p2997_p2 = scmp.lt.u32.totalorder %s2995_s28, %s2990_s13  ;;  %p2999_p6 = scmp.lt.u32.totalorder %s2990_s13, %s3252_s22 }
  0x5e   : > { %p2993_p12 = pnand %p2992_p11, %p2991_p7 }
  0x5f   : > { %p2998_p3 = por %p2997_p2, %p2996_p0 }
  0x60   : > { %p2994_p13 = pneg %p2993_p12 }
  0x61   : > { %p3000_p9 = por %p2999_p6, %p2998_p3 }
  0x63   : > { %p3001_p8 = pnand %p3000_p9, %p2994_p13 }
  0x65   : > { %3004 = shalt.err (!%p3001_p8)
}
  0x66   : > { %s3005_s12 = scalar_lea.vmem %s3254_s14, 1792  ;;  %s3071_s16 = smov [#allocation2]  }
  0x67   : > { %p3006_p1 = scmp.ne.s32.totalorder %s3254_s14, %s3005_s12  ;;  %s3010_s20 = sshll.u32 %s3071_s16, 4  ;;  %s3011_s20 = int_to_ptr.vmem [resolvable:$false] %s3010_s20 }
  0x68   : > { %s3012_s21 = scalar_lea.vmem %s3011_s20, 3584  ;;  %p3013_p7 = scmp.lt.s32.totalorder %s3254_s14, %s3011_s20 }
  0x69   : > { %p3008_p4 = pnand %p3006_p1, %p2992_p11  ;;  %p3014_p12 = scmp.lt.s32.totalorder %s3012_s21, %s3005_s12 }
  0x6b   : > { %p3009_p5 = pneg %p3008_p4  ;;  %p3015_p0 = por %p3014_p12, %p3013_p7 }
  0x6d   : > { %p3016_p2 = pnand %p3015_p0, %p3009_p5 }
  0x6f   : > { %3019 = shalt.err (!%p3016_p2)
}
  0x70   : > { %s3072_s23 = smov 896   ;;  %s3073_s13 = smov 56  }
  0x71   : > { %2626 = dma.hbm_to_vmem [thread:$0]  (!%p3245_p10), %s3252_s22, 1792, %s3254_s14, %s3256_s10, %s3072_s23, %s3072_s23, %s3073_s13  }
  0x72   : > { %p3398_p11 = scmp.ne.s32.totalorder %s3394_s8, 0 }
  0x73   : > { %s292_s24 = sand.u32 (!%p3398_p11), 1, %s3054_s25   ;;  %p3399_p13 = scmp.ne.s32.totalorder (!%p3398_p11), %s3393_s30, 0 }
  0x74   : > { %290 = sbr.rel (%p3398_p11) target bundleno = 1027 (0x403), region = 48  ;;  %s293_s28 = scalar_lea.sflag (!%p3398_p11), [#allocation3], %s292_s24 }
  0x75   : > { %s2598_s9 = smul.u32 (!%p3398_p11), 112, %s292_s24 }
  0x77   : > { %s3287_s19 = scalar_lea.vmem (!%p3398_p11), [#allocation2], %s2598_s9 }
  0x7b   : > { %3037 = dma.done.wait (%p3399_p13), %s293_s28, 1792  }
  0x7c   : > { %3039 = vsyncadd (%p3399_p13), %s293_s28, 4294965504  ;;  %p3400_p3 = scmp.ne.s32.totalorder %s3392_s29, 0 }
  0x7e   : > { %3041 = dma.done.wait (%p3400_p3), [#allocation5], 21888  }
  0x7f   : > { %3043 = vsyncadd (%p3400_p3), [#allocation5], 4294945408 }
  0x80   : > { %3045 = dma.done.wait (%p3400_p3), [#allocation8], 1024  }
  0x81   : > { %3047 = vsyncadd (%p3400_p3), [#allocation8], 4294966272  ;;  %v2678_v0 = vld [vmem:[#allocation4 + $0x4] ss:$12 sps:$4 sm:$0xff]   ;;  %v2680_v1 = vld [vmem:[#allocation4] ss:$12 sps:$4 sm:$0xff]  }
  0x82   : > { %1369 = vmatprep.subr.bf16.mxu0 %v2678_v0  ;;  %v2681_v2 = vld [vmem:[#allocation4 + $0x1c] ss:$12 sps:$4 sm:$0xff]   ;;  %v2683_v3 = vld [vmem:[#allocation4 + $0x18] ss:$12 sps:$4 sm:$0xff]   ;;  %v2684_v4 = vld [vmem:[#allocation4 + $0x34] ss:$12 sps:$4 sm:$0xff]  }
  0x83   : > { %1370 = vmatpush1.bf16.msra.mxu0 %v2680_v1  ;;  %v2686_v5 = vld [vmem:[#allocation4 + $0x30] ss:$12 sps:$4 sm:$0xff]   ;;  %v2687_v6 = vld [vmem:[#allocation4 + $0x4c] ss:$12 sps:$4 sm:$0xff]   ;;  %v2689_v7 = vld [vmem:[#allocation4 + $0x48] ss:$12 sps:$4 sm:$0xff]  }
  0x84   : > { %1371 = vmatprep.subr.bf16.mxu0 %v2681_v2  ;;  %v2690_v8 = vld [vmem:[#allocation4 + $0x64] ss:$12 sps:$4 sm:$0xff]   ;;  %v2692_v9 = vld [vmem:[#allocation4 + $0x60] ss:$12 sps:$4 sm:$0xff]   ;;  %v2693_v10 = vld [vmem:[#allocation4 + $0x7c] ss:$12 sps:$4 sm:$0xff]  }
  0x85   : > { %v2695_v11 = vld [vmem:[#allocation4 + $0x78] ss:$12 sps:$4 sm:$0xff]   ;;  %v2696_v12 = vld [vmem:[#allocation4 + $0x94] ss:$12 sps:$4 sm:$0xff]   ;;  %v2698_v16 = vld [vmem:[#allocation4 + $0x90] ss:$12 sps:$4 sm:$0xff]  }
  0x86   : > { %v348_v13 = vld [vmem:[%s3287_s19 + $0x8] sm:$0xff]  ;;  %v355_v14 = vld [vmem:[%s3287_s19 + $0x40] sm:$0xff]  ;;  %v354_v51 = vld [vmem:[%s3287_s19 + $0x38] sm:$0xff]  ;;  %vm1365_vm0 = vcmask 130048   ;;  %vm3075_vm1 = vmmov 0   ;;  %s3401_s22 = sadd.s32 4294967295, %s3062_s27  }
  0x87   : > { %1372 = vmatpush1.bf16.msra.mxu0 %v2683_v3  ;;  %v362_v15 = vpack.c.bf16 %v355_v14, %v348_v13  ;;  %v2699_v17 = vld [vmem:[#allocation4 + $0xac] ss:$12 sps:$4 sm:$0xff]   ;;  %v2701_v18 = vld [vmem:[#allocation4 + $0xa8] ss:$12 sps:$4 sm:$0xff]   ;;  %v2702_v21 = vld [vmem:[#allocation4 + $0xc4] ss:$12 sps:$4 sm:$0xff]  }
  0x88   : > { %1373 = vmatprep.subr.bf16.mxu0 %v2684_v4  ;;  %v2732_v19 = vld [vmem:[#allocation4 + $0xc8] ss:$12 sps:$4 sm:$0xff]   ;;  %v2737_v22 = vld [vmem:[#allocation4 + $0xe0] ss:$12 sps:$4 sm:$0xff]   ;;  %v2742_v26 = vld [vmem:[#allocation4 + $0xf8] ss:$12 sps:$4 sm:$0xff]  }
  0x89   : > { %1401 = vmatprep.mubr.bf16.mxu0 %v362_v15  ;;  %1573 = vmatprep.mubr.bf16.mxu1 %v362_v15  ;;  %v2733_v20 = vld [vmem:[#allocation4 + $0x8] ss:$12 sps:$4 sm:$0xff]   ;;  %v2738_v23 = vld [vmem:[#allocation4 + $0x20] ss:$12 sps:$4 sm:$0xff]   ;;  %v2743_v27 = vld [vmem:[#allocation4 + $0x38] ss:$12 sps:$4 sm:$0xff]  }
  0x8a   : > { %2426 = vmatprep.subr.bf16.mxu1 %v2732_v19  ;;  %v2704_v24 = vld [vmem:[#allocation4 + $0xc0] ss:$12 sps:$4 sm:$0xff]   ;;  %v2705_v25 = vld [vmem:[#allocation4 + $0xdc] ss:$12 sps:$4 sm:$0xff]   ;;  %v2707_v28 = vld [vmem:[#allocation4 + $0xd8] ss:$12 sps:$4 sm:$0xff]  }
  0x8b   : > { %1374 = vmatpush1.bf16.msra.mxu0 %v2686_v5  ;;  %2427 = vmatpush3.bf16.msra.mxu1 %v2733_v20  ;;  %v2708_v29 = vld [vmem:[#allocation4 + $0xf4] ss:$12 sps:$4 sm:$0xff]   ;;  %v2747_v30 = vld [vmem:[#allocation4 + $0x110] ss:$12 sps:$4 sm:$0xff]   ;;  %v2711_v34 = vld [vmem:[#allocation4 + $0x10c] ss:$12 sps:$4 sm:$0xff]  }
  0x8c   : > { %1375 = vmatprep.subr.bf16.mxu0 %v2687_v6  ;;  %2428 = vmatprep.subr.bf16.mxu1 %v2737_v22  ;;  %v2748_v31 = vld [vmem:[#allocation4 + $0x50] ss:$12 sps:$4 sm:$0xff]   ;;  %v2752_v33 = vld [vmem:[#allocation4 + $0x128] ss:$12 sps:$4 sm:$0xff]   ;;  %v2757_v36 = vld [vmem:[#allocation4 + $0x140] ss:$12 sps:$4 sm:$0xff]  }
  0x8d   : > { %v2710_v32 = vld [vmem:[#allocation4 + $0xf0] ss:$12 sps:$4 sm:$0xff]   ;;  %v2753_v35 = vld [vmem:[#allocation4 + $0x68] ss:$12 sps:$4 sm:$0xff]   ;;  %v2758_v39 = vld [vmem:[#allocation4 + $0x80] ss:$12 sps:$4 sm:$0xff]  }
  0x8e   : > { %v2713_v37 = vld [vmem:[#allocation4 + $0x108] ss:$12 sps:$4 sm:$0xff]   ;;  %v2714_v38 = vld [vmem:[#allocation4 + $0x124] ss:$12 sps:$4 sm:$0xff]   ;;  %v2716_v41 = vld [vmem:[#allocation4 + $0x120] ss:$12 sps:$4 sm:$0xff]  }
  0x8f   : > { %1376 = vmatpush1.bf16.msra.mxu0 %v2689_v7  ;;  %2429 = vmatpush3.bf16.msra.mxu1 %v2738_v23  ;;  %v2762_v40 = vld [vmem:[#allocation4 + $0x158] ss:$12 sps:$4 sm:$0xff]   ;;  %v2717_v42 = vld [vmem:[#allocation4 + $0x13c] ss:$12 sps:$4 sm:$0xff]   ;;  %v2720_v46 = vld [vmem:[#allocation4 + $0x154] ss:$12 sps:$4 sm:$0xff]  }
  0x90   : > { %1377 = vmatprep.subr.bf16.mxu0 %v2690_v8  ;;  %2430 = vmatprep.subr.bf16.mxu1 %v2742_v26  ;;  %v2763_v43 = vld [vmem:[#allocation4 + $0x98] ss:$12 sps:$4 sm:$0xff]   ;;  %v2767_v44 = vld [vmem:[#allocation4 + $0x170] ss:$12 sps:$4 sm:$0xff]   ;;  %v2772_v50 = vld [vmem:[#allocation4 + $0x248] ss:$12 sps:$4 sm:$0xff]  }
  0x91   : > { %v2719_v45 = vld [vmem:[#allocation4 + $0x138] ss:$12 sps:$4 sm:$0xff]   ;;  %v2722_v47 = vld [vmem:[#allocation4 + $0x150] ss:$12 sps:$4 sm:$0xff]   ;;  %v2773_v53 = vld [vmem:[#allocation4 + $0x188] ss:$12 sps:$4 sm:$0xff]  }
  0x92   : > { %v347_v48 = vld [vmem:[%s3287_s19] sm:$0xff]  ;;  %v2723_v52 = vld [vmem:[#allocation4 + $0x16c] ss:$12 sps:$4 sm:$0xff]   ;;  %v2731_v61 = vld [vmem:[#allocation4 + $0x19c] ss:$12 sps:$4 sm:$0xff]   ;;  %s2230_s14 = sshll.u32 %s3401_s22, 1 }
  0x93   : > { %1378 = vmatpush1.bf16.msra.mxu0 %v2692_v9  ;;  %2431 = vmatpush3.bf16.msra.mxu1 %v2743_v27  ;;  %v2768_v49 = vld [vmem:[#allocation4 + $0xb0] ss:$12 sps:$4 sm:$0xff]   ;;  %v361_v54 = vpack.c.bf16 %v354_v51, %v347_v48  ;;  %v2777_v55 = vld [vmem:[#allocation4 + $0x260] ss:$12 sps:$4 sm:$0xff]   ;;  %v2725_v56 = vld [vmem:[#allocation4 + $0x168] ss:$12 sps:$4 sm:$0xff]  }
  0x94   : > { %1379 = vmatprep.subr.bf16.mxu0 %v2693_v10  ;;  %2432 = vmatprep.subr.bf16.mxu1 %v2747_v30  ;;  %v2728_v57 = vld [vmem:[#allocation4 + $0x184] ss:$12 sps:$4 sm:$0xff]   ;;  %v2778_v58 = vld [vmem:[#allocation4 + $0x1a0] ss:$12 sps:$4 sm:$0xff]   ;;  %v2792_v3 = vld [vmem:[#allocation4 + $0x2a8] ss:$12 sps:$4 sm:$0xff]  }
  0x95   : > { %v2782_v59 = vld [vmem:[#allocation4 + $0x278] ss:$12 sps:$4 sm:$0xff]   ;;  %v2726_v60 = vld [vmem:[#allocation4 + $0x180] ss:$12 sps:$4 sm:$0xff]   ;;  %v2787_v63 = vld [vmem:[#allocation4 + $0x290] ss:$12 sps:$4 sm:$0xff]  }
  0x96   : > { %v2783_v62 = vld [vmem:[#allocation4 + $0x1b8] ss:$12 sps:$4 sm:$0xff]   ;;  %v2736_v1 = vld [vmem:[#allocation4 + $0x1b4] ss:$12 sps:$4 sm:$0xff]   ;;  %v2788_v2 = vld [vmem:[#allocation4 + $0x1d0] ss:$12 sps:$4 sm:$0xff]  }
  0x97   : > { %1380 = vmatpush1.bf16.msra.mxu0 %v2695_v11  ;;  %2433 = vmatpush3.bf16.msra.mxu1 %v2748_v31  ;;  %v2729_v0 = vld [vmem:[#allocation4 + $0x198] ss:$12 sps:$4 sm:$0xff]   ;;  %v2734_v4 = vld [vmem:[#allocation4 + $0x1b0] ss:$12 sps:$4 sm:$0xff]   ;;  %v2793_v6 = vld [vmem:[#allocation4 + $0x1e8] ss:$12 sps:$4 sm:$0xff]  }
  0x98   : > { %1381 = vmatprep.subr.bf16.mxu0 %v2696_v12  ;;  %2434 = vmatprep.subr.bf16.mxu1 %v2752_v33  ;;  %v2741_v5 = vld [vmem:[#allocation4 + $0x1cc] ss:$12 sps:$4 sm:$0xff]   ;;  %v357_v9 = vld [vmem:[%s3287_s19 + $0x50] sm:$0xff]  ;;  %p341_p10 = scmp.lt.s32.totalorder %s2230_s14, 3 }
  0x99   : > { %v2797_v7 = vld [vmem:[#allocation4 + $0x2c0] ss:$12 sps:$4 sm:$0xff]   ;;  %v2739_v10 = vld [vmem:[#allocation4 + $0x1c8] ss:$12 sps:$4 sm:$0xff]   ;;  %v2746_v12 = vld [vmem:[#allocation4 + $0x1e4] ss:$12 sps:$4 sm:$0xff]  }
  0x9a   : > { %v350_v8 = vld [vmem:[%s3287_s19 + $0x18] sm:$0xff]  ;;  %v2756_v20 = vld [vmem:[#allocation4 + $0x214] ss:$12 sps:$4 sm:$0xff]   ;;  %v2766_v31 = vld [vmem:[#allocation4 + $0x244] ss:$12 sps:$4 sm:$0xff]   ;;  %s3407_s14 = smov (!%p341_p10, %s2230_s14), 3 }
  0x9b   : > { %1382 = vmatpush1.bf16.msra.mxu0 %v2698_v16  ;;  %2435 = vmatpush3.bf16.msra.mxu1 %v2753_v35  ;;  %v364_v11 = vpack.c.bf16 %v357_v9, %v350_v8  ;;  %v2798_v13 = vld [vmem:[#allocation4 + $0x200] ss:$12 sps:$4 sm:$0xff]   ;;  %v2802_v14 = vld [vmem:[#allocation4 + $0x2d8] ss:$12 sps:$4 sm:$0xff]   ;;  %v2751_v16 = vld [vmem:[#allocation4 + $0x1fc] ss:$12 sps:$4 sm:$0xff]  }
  0x9c   : > { %1383 = vmatprep.subr.bf16.mxu0 %v2699_v17  ;;  %2436 = vmatprep.subr.bf16.mxu1 %v2757_v36  ;;  %v2744_v15 = vld [vmem:[#allocation4 + $0x1e0] ss:$12 sps:$4 sm:$0xff]   ;;  %v2803_v17 = vld [vmem:[#allocation4 + $0x218] ss:$12 sps:$4 sm:$0xff]   ;;  %v2808_v22 = vld [vmem:[#allocation4 + $0x230] ss:$12 sps:$4 sm:$0xff]  }
  0x9d   : > { %v2749_v19 = vld [vmem:[#allocation4 + $0x1f8] ss:$12 sps:$4 sm:$0xff]   ;;  %v2813_v27 = vld [vmem:[#allocation4 + $0x308] ss:$12 sps:$4 sm:$0xff]   ;;  %v2838_v51 = vld [vmem:[#allocation4 + $0x380] ss:$12 sps:$4 sm:$0xff]  }
  0x9e   : > { %v349_v23 = vld [vmem:[%s3287_s19 + $0x10] sm:$0xff]  ;;  %v2761_v26 = vld [vmem:[#allocation4 + $0x22c] ss:$12 sps:$4 sm:$0xff]   ;;  %v2771_v35 = vld [vmem:[#allocation4 + $0x25c] ss:$12 sps:$4 sm:$0xff]   ;;  %s2231_s12 = sshll.u32 %s3407_s14, 2 }
  0x9f   : > { %1384 = vmatpush1.bf16.msra.mxu0 %v2701_v18  ;;  %2437 = vmatpush3.bf16.msra.mxu1 %v2758_v39  ;;  %v2807_v18 = vld [vmem:[#allocation4 + $0x2f0] ss:$12 sps:$4 sm:$0xff]   ;;  %v2759_v30 = vld [vmem:[#allocation4 + $0x228] ss:$12 sps:$4 sm:$0xff]   ;;  %v2822_v33 = vld [vmem:[#allocation4 + $0x3f8] ss:$12 sps:$4 sm:$0xff]   ;;  %s344_s21 = scalar_lea.vmem %s3386_s7, %s2231_s12 }
  0xa0   : > { %1385 = vmatprep.subr.bf16.mxu0 %v2702_v21  ;;  %2438 = vmatprep.subr.bf16.mxu1 %v2762_v40  ;;  %v2754_v21 = vld [vmem:[#allocation4 + $0x210] ss:$12 sps:$4 sm:$0xff]   ;;  %v2823_v36 = vld [vmem:[#allocation4 + $0x338] ss:$12 sps:$4 sm:$0xff]   ;;  %v2776_v39 = vld [vmem:[#allocation4 + $0x274] ss:$12 sps:$4 sm:$0xff]  }
  0xa1   : > { %v2828_v40 = vld [vmem:[#allocation4 + $0x350] ss:$12 sps:$4 sm:$0xff]  }
  0xa2   : > { %v2811_v8 = vld [vmem:[#allocation4 + $0x31c] ss:$12 sps:$4 sm:$0xff]  }
  0xa3   : > { %1386 = vmatpush1.bf16.msra.mxu0 %v2704_v24  ;;  %2439 = vmatpush3.bf16.msra.mxu1 %v2763_v43  ;;  %v2812_v24 = vld [vmem:[#allocation4 + $0x3c8] ss:$12 sps:$4 sm:$0xff]   ;;  %v2781_v43 = vld [vmem:[#allocation4 + $0x28c] ss:$12 sps:$4 sm:$0xff]  }
  0xa4   : > { %1387 = vmatprep.subr.bf16.mxu0 %v2705_v25  ;;  %2440 = vmatprep.subr.bf16.mxu1 %v2767_v44  ;;  %v356_v25 = vld [vmem:[%s3287_s19 + $0x48] sm:$0xff] }
  0xa5   : > { %v2833_v44 = vld [vmem:[#allocation4 + $0x368] ss:$12 sps:$4 sm:$0xff]  }
  0xa7   : > { %1388 = vmatpush1.bf16.msra.mxu0 %v2707_v28  ;;  %2441 = vmatpush3.bf16.msra.mxu1 %v2768_v49  ;;  %v3309_v28 = vpack.c.bf16 %v356_v25, %v349_v23  ;;  %v2779_v49 = vld [vmem:[#allocation4 + $0x288] ss:$12 sps:$4 sm:$0xff]   ;;  %v2846_v23 = vld [vmem:[#allocation4 + $0x3c4] ss:$12 sps:$4 sm:$0xff]  }
  0xa8   : > { %1389 = vmatprep.subr.bf16.mxu0 %v2708_v29  ;;  %2448 = vmatprep.subr.bf16.mxu1 %v2772_v50  ;;  %v2817_v29 = vld [vmem:[#allocation4 + $0x3e0] ss:$12 sps:$4 sm:$0xff]   ;;  %v2786_v50 = vld [vmem:[#allocation4 + $0x2a4] ss:$12 sps:$4 sm:$0xff]   ;;  %v2851_v25 = vld [vmem:[#allocation4 + $0x3dc] ss:$12 sps:$4 sm:$0xff]  }
  0xaa   : > { %1574 = vmatmul.mubr.bf16.vlgmr.msra.gmra.mrb[0].mxu1 %v361_v54 }
  0xab   : > { %1390 = vmatpush1.bf16.msra.mxu0 %v2710_v32  ;;  %2449 = vmatpush3.bf16.msra.mxu1 %v2773_v53  ;;  %v2818_v32 = vld [vmem:[#allocation4 + $0x320] ss:$12 sps:$4 sm:$0xff]  }
  0xac   : > { %1391 = vmatprep.subr.bf16.mxu0 %v2711_v34  ;;  %2450 = vmatprep.subr.bf16.mxu1 %v2777_v55  ;;  %v2764_v34 = vld [vmem:[#allocation4 + $0x240] ss:$12 sps:$4 sm:$0xff]   ;;  %v2843_v55 = vld [vmem:[#allocation4 + $0x398] ss:$12 sps:$4 sm:$0xff]  }
  0xad   : > { %1614 = vmatprep.mubr.bf16.mxu1 %v364_v11  ;;  %v2784_v53 = vld [vmem:[#allocation4 + $0x2a0] ss:$12 sps:$4 sm:$0xff]  }
  0xaf   : > { %1392 = vmatpush1.bf16.msra.mxu0 %v2713_v37  ;;  %2451 = vmatpush3.bf16.msra.mxu1 %v2778_v58  ;;  %v2827_v37 = vld [vmem:[#allocation4 + $0x410] ss:$12 sps:$4 sm:$0xff]   ;;  %v2796_v58 = vld [vmem:[#allocation4 + $0x2d4] ss:$12 sps:$4 sm:$0xff]  }
  0xb0   : > { %1393 = vmatprep.subr.bf16.mxu0 %v2714_v38  ;;  %2452 = vmatprep.subr.bf16.mxu1 %v2782_v59  ;;  %v2769_v38 = vld [vmem:[#allocation4 + $0x258] ss:$12 sps:$4 sm:$0xff]   ;;  %v2848_v59 = vld [vmem:[#allocation4 + $0x3b0] ss:$12 sps:$4 sm:$0xff]  }
  0xb3   : > { %1394 = vmatpush1.bf16.msra.mxu0 %v2716_v41  ;;  %2453 = vmatpush3.bf16.msra.mxu1 %v2783_v62  ;;  %v2832_v41 = vld [vmem:[#allocation4 + $0x428] ss:$12 sps:$4 sm:$0xff]   ;;  %v2794_v62 = vld [vmem:[#allocation4 + $0x2d0] ss:$12 sps:$4 sm:$0xff]  }
  0xb4   : > { %1395 = vmatprep.subr.bf16.mxu0 %v2717_v42  ;;  %2454 = vmatprep.subr.bf16.mxu1 %v2787_v63  ;;  %v2774_v42 = vld [vmem:[#allocation4 + $0x270] ss:$12 sps:$4 sm:$0xff]   ;;  %v2801_v63 = vld [vmem:[#allocation4 + $0x2ec] ss:$12 sps:$4 sm:$0xff]  }
  0xb7   : > { %1396 = vmatpush1.bf16.msra.mxu0 %v2719_v45  ;;  %2455 = vmatpush3.bf16.msra.mxu1 %v2788_v2  ;;  %v352_v45 = vld [vmem:[%s3287_s19 + $0x28] sm:$0xff] }
  0xb8   : > { %1397 = vmatprep.subr.bf16.mxu0 %v2720_v46  ;;  %2456 = vmatprep.subr.bf16.mxu1 %v2792_v3  ;;  %v359_v46 = vld [vmem:[%s3287_s19 + $0x60] sm:$0xff] }
  0xb9   : > { %v366_v48 = vpack.c.bf16 %v359_v46, %v352_v45  ;;  %v2799_v2 = vld [vmem:[#allocation4 + $0x2e8] ss:$12 sps:$4 sm:$0xff]   ;;  %v2806_v3 = vld [vmem:[#allocation4 + $0x304] ss:$12 sps:$4 sm:$0xff]  }
  0xba   : > { %v2877_v45 = vld [vmem:[#allocation6 + $0x8] sm:$0xff]   ;;  %v2878_v46 = vld [vmem:[#allocation6 + $0x50] sm:$0xff]  }
  0xbb   : > { %1398 = vmatpush1.bf16.msra.mxu0 %v2722_v47  ;;  %2457 = vmatpush3.bf16.msra.mxu1 %v2793_v6  ;;  %v2837_v47 = vld [vmem:[#allocation4 + $0x440] ss:$12 sps:$4 sm:$0xff]  }
  0xbc   : > { %1399 = vmatprep.subr.bf16.mxu0 %v2723_v52  ;;  %2458 = vmatprep.subr.bf16.mxu1 %v2797_v7  ;;  %v2842_v52 = vld [vmem:[#allocation4 + $0x458] ss:$12 sps:$4 sm:$0xff]   ;;  %v2804_v7 = vld [vmem:[#allocation4 + $0x300] ss:$12 sps:$4 sm:$0xff]  }
  0xbd   : > { %v360_v6 = vld [vmem:[%s3287_s19 + $0x68] sm:$0xff] }
  0xbf   : > { %1400 = vmatpush1.bf16.msra.mxu0 %v2725_v56  ;;  %2459 = vmatpush3.bf16.msra.mxu1 %v2798_v13  ;;  %v2789_v56 = vld [vmem:[#allocation4 + $0x2b8] ss:$12 sps:$4 sm:$0xff]  }
  0xc0   : > { %1412 = vmatprep.subr.bf16.mxu0 %v2728_v57  ;;  %2460 = vmatprep.subr.bf16.mxu1 %v2802_v14  ;;  %v2847_v57 = vld [vmem:[#allocation4 + $0x470] ss:$12 sps:$4 sm:$0xff]   ;;  %v2821_v13 = vld [vmem:[#allocation4 + $0x34c] ss:$12 sps:$4 sm:$0xff]   ;;  %v2819_v14 = vld [vmem:[#allocation4 + $0x348] ss:$12 sps:$4 sm:$0xff]  }
  0xc2   : > { %1402 = vmatmul.mubr.bf16.vlgmr.msra.gmra.mrb[0].mxu0 %v361_v54  ;;  %v2791_v54 = vld [vmem:[#allocation4 + $0x2bc] ss:$12 sps:$4 sm:$0xff]  }
  0xc3   : > { %1413 = vmatpush1.bf16.msra.mxu0 %v2726_v60  ;;  %1444 = vmatprep.mubr.bf16.mxu0 %v364_v11  ;;  %v351_v60 = vld [vmem:[%s3287_s19 + $0x20] sm:$0xff] }
  0xc4   : > { %1414 = vmatprep.subr.bf16.mxu0 %v2731_v61  ;;  %2461 = vmatpush3.bf16.msra.mxu1 %v2803_v17  ;;  %v358_v61 = vld [vmem:[%s3287_s19 + $0x58] sm:$0xff]  ;;  %v2816_v11 = vld [vmem:[#allocation4 + $0x334] ss:$12 sps:$4 sm:$0xff]  }
  0xc5   : > { %2462 = vmatprep.subr.bf16.mxu1 %v2807_v18  ;;  %v2831_v17 = vld [vmem:[#allocation4 + $0x37c] ss:$12 sps:$4 sm:$0xff]   ;;  %v2829_v18 = vld [vmem:[#allocation4 + $0x378] ss:$12 sps:$4 sm:$0xff]  }
  0xc7   : > { %1415 = vmatpush1.bf16.msra.mxu0 %v2729_v0  ;;  %v2855_v0 = vld [vmem:[#allocation4 + $0x488] ss:$12 sps:$4 sm:$0xff]  }
  0xc8   : > { %1416 = vmatprep.subr.bf16.mxu0 %v2736_v1  ;;  %2463 = vmatpush3.bf16.msra.mxu1 %v2808_v22  ;;  %v3316_v1 = vpack.c.bf16 %v358_v61, %v351_v60  ;;  %v2839_v22 = vld [vmem:[#allocation4 + $0x3a8] ss:$12 sps:$4 sm:$0xff]   ;;  %v566_v60 = vlaneseq }
  0xc9   : > { %2470 = vmatprep.subr.bf16.mxu1 %v2812_v24  ;;  %v2844_v24 = vld [vmem:[#allocation4 + $0x3c0] ss:$12 sps:$4 sm:$0xff]  }
  0xca   : > { %v2886_v61 = vld [vmem:[#allocation6 + $0x70] sm:$0xff]  }
  0xcb   : > { %1417 = vmatpush1.bf16.msra.mxu0 %v2734_v4  ;;  %1615 = vmatmul.mubr.bf16.vlgmr.msra.gmra.mrb[4].mxu1 %v3309_v28  ;;  %v3074_v4 = vmov 0.0  }
  0xcc   : > { %1418 = vmatprep.subr.bf16.mxu0 %v2741_v5  ;;  %2471 = vmatpush3.bf16.msra.mxu1 %v2813_v27  ;;  %v353_v5 = vld [vmem:[%s3287_s19 + $0x30] sm:$0xff] }
  0xcd   : > { %2472 = vmatprep.subr.bf16.mxu1 %v2817_v29  ;;  %1655 = vmatprep.mubr.bf16.mxu1 %v366_v48  ;;  %v3324_v9 = vpack.c.bf16 %v360_v6, %v353_v5  ;;  %v2854_v27 = vld [vmem:[#allocation4 + $0x3f4] ss:$12 sps:$4 sm:$0xff]   ;;  %v2858_v29 = vld [vmem:[#allocation4 + $0x40c] ss:$12 sps:$4 sm:$0xff]  }
  0xcf   : > { %1419 = vmatpush1.bf16.msra.mxu0 %v2739_v10  ;;  %v2809_v10 = vld [vmem:[#allocation4 + $0x318] ss:$12 sps:$4 sm:$0xff]  }
  0xd0   : > { %1420 = vmatprep.subr.bf16.mxu0 %v2746_v12  ;;  %2473 = vmatpush3.bf16.msra.mxu1 %v2818_v32  ;;  %v2814_v12 = vld [vmem:[#allocation4 + $0x330] ss:$12 sps:$4 sm:$0xff]   ;;  %v2859_v32 = vld [vmem:[#allocation4 + $0x420] ss:$12 sps:$4 sm:$0xff]  }
  0xd1   : > { %2474 = vmatprep.subr.bf16.mxu1 %v2822_v33  ;;  %v2864_v33 = vld [vmem:[#allocation4 + $0x43c] ss:$12 sps:$4 sm:$0xff]  }
  0xd3   : > { %1421 = vmatpush1.bf16.msra.mxu0 %v2744_v15  ;;  %v2826_v15 = vld [vmem:[#allocation4 + $0x364] ss:$12 sps:$4 sm:$0xff]  }
  0xd4   : > { %1422 = vmatprep.subr.bf16.mxu0 %v2751_v16  ;;  %2475 = vmatpush3.bf16.msra.mxu1 %v2823_v36  ;;  %v2824_v16 = vld [vmem:[#allocation4 + $0x360] ss:$12 sps:$4 sm:$0xff]   ;;  %v2865_v36 = vld [vmem:[#allocation4 + $0x450] ss:$12 sps:$4 sm:$0xff]  }
  0xd5   : > { %2476 = vmatprep.subr.bf16.mxu1 %v2827_v37  ;;  %v2870_v37 = vld [vmem:[#allocation4 + $0x46c] ss:$12 sps:$4 sm:$0xff]  }
  0xd7   : > { %1423 = vmatpush1.bf16.msra.mxu0 %v2749_v19  ;;  %v2836_v19 = vld [vmem:[#allocation4 + $0x394] ss:$12 sps:$4 sm:$0xff]  }
  0xd8   : > { %1424 = vmatprep.subr.bf16.mxu0 %v2756_v20  ;;  %2477 = vmatpush3.bf16.msra.mxu1 %v2828_v40  ;;  %v2834_v20 = vld [vmem:[#allocation4 + $0x390] ss:$12 sps:$4 sm:$0xff]   ;;  %v2871_v40 = vld [vmem:[#allocation4 + $0x480] ss:$12 sps:$4 sm:$0xff]  }
  0xd9   : > { %2478 = vmatprep.subr.bf16.mxu1 %v2832_v41  ;;  %v3076_v41 = vmov 0  }
  0xdb   : > { %1425 = vmatpush1.bf16.msra.mxu0 %v2754_v21  ;;  %v2841_v21 = vld [vmem:[#allocation4 + $0x3ac] ss:$12 sps:$4 sm:$0xff]  }
  0xdc   : > { %1426 = vmatprep.subr.bf16.mxu0 %v2761_v26  ;;  %2479 = vmatpush3.bf16.msra.mxu1 %v2833_v44  ;;  %v2849_v26 = vld [vmem:[#allocation4 + $0x3d8] ss:$12 sps:$4 sm:$0xff]  }
  0xdd   : > { %2480 = vmatprep.subr.bf16.mxu1 %v2837_v47  ;;  %v2876_v44 = vld [vmem:[#allocation6 + $0x48] sm:$0xff]   ;;  %v2879_v47 = vld [vmem:[#allocation6 + $0x10] sm:$0xff]  }
  0xdf   : > { %1427 = vmatpush1.bf16.msra.mxu0 %v2759_v30  ;;  %v2856_v30 = vld [vmem:[#allocation4 + $0x408] ss:$12 sps:$4 sm:$0xff]  }
  0xe0   : > { %1428 = vmatprep.subr.bf16.mxu0 %v2766_v31  ;;  %2481 = vmatpush3.bf16.msra.mxu1 %v2838_v51  ;;  %v2861_v31 = vld [vmem:[#allocation4 + $0x424] ss:$12 sps:$4 sm:$0xff]   ;;  %v2883_v51 = vld [vmem:[#allocation6 + $0x20] sm:$0xff]  }
  0xe1   : > { %2482 = vmatprep.subr.bf16.mxu1 %v2842_v52  ;;  %v2884_v52 = vld [vmem:[#allocation6 + $0x68] sm:$0xff]  }
  0xe3   : > { %1429 = vmatpush1.bf16.msra.mxu0 %v2764_v34  ;;  %v2862_v34 = vld [vmem:[#allocation4 + $0x438] ss:$12 sps:$4 sm:$0xff]  }
  0xe4   : > { %1430 = vmatprep.subr.bf16.mxu0 %v2771_v35  ;;  %2483 = vmatpush3.bf16.msra.mxu1 %v2843_v55  ;;  %v2867_v35 = vld [vmem:[#allocation4 + $0x454] ss:$12 sps:$4 sm:$0xff]  }
  0xe5   : > { %2484 = vmatprep.subr.bf16.mxu1 %v2847_v57 }
  0xe7   : > { %1431 = vmatpush1.bf16.msra.mxu0 %v2769_v38  ;;  %v2868_v38 = vld [vmem:[#allocation4 + $0x468] ss:$12 sps:$4 sm:$0xff]  }
  0xe8   : > { %1432 = vmatprep.subr.bf16.mxu0 %v2776_v39  ;;  %2485 = vmatpush3.bf16.msra.mxu1 %v2848_v59  ;;  %v2873_v39 = vld [vmem:[#allocation4 + $0x484] ss:$12 sps:$4 sm:$0xff]  }
  0xe9   : > { %2534 = vmatprep.subr.bf16.mxu1 %v3074_v4 }
  0xeb   : > { %1433 = vmatpush1.bf16.msra.mxu0 %v2774_v42  ;;  %1656 = vmatmul.mubr.bf16.vlgmr.msra.gmra.mrb[8].mxu1 %v3316_v1  ;;  %v2874_v42 = vld [vmem:[#allocation6 + $0x40] sm:$0xff]  }
  0xec   : > { %1434 = vmatprep.subr.bf16.mxu0 %v2781_v43  ;;  %2535 = vmatpush3.bf16.msra.mxu1 %v2855_v0  ;;  %v2875_v43 = vld [vmem:[#allocation6] sm:$0xff]   ;;  %v2888_v0 = vld [vmem:[#allocation6 + $0x78] sm:$0xff]  }
  0xed   : > { %2536 = vmatprep.mubr.msk.bf16.mxu1 %vm3075_vm1, %v3074_v4  ;;  %2494 = vmatprep.subr.bf16.mxu1 %v2874_v42 }
  0xef   : > { %1435 = vmatpush1.bf16.msra.mxu0 %v2779_v49  ;;  %v2881_v49 = vld [vmem:[#allocation6 + $0x18] sm:$0xff]  }
  0xf0   : > { %1436 = vmatprep.subr.bf16.mxu0 %v2786_v50  ;;  %v2882_v50 = vld [vmem:[#allocation6 + $0x60] sm:$0xff]  }
  0xf3   : > { %1437 = vmatpush1.bf16.msra.mxu0 %v2784_v53  ;;  %2537 = vmatmul.mubr.msk.bf16.vlgmr.msra.gmra.mrb[12].mxu1 %vm1365_vm0, %v3324_v9  ;;  %v2885_v53 = vld [vmem:[#allocation6 + $0x28] sm:$0xff]  }
  0xf4   : > { %1438 = vmatprep.subr.bf16.mxu0 %v2791_v54  ;;  %2495 = vmatpush3.bf16.msra.mxu1 %v2875_v43 }
  0xf5   : > { %2496 = vmatprep.subr.bf16.mxu1 %v2876_v44 }
  0xf7   : > { %1439 = vmatpush1.bf16.msra.mxu0 %v2789_v56 }
  0xf8   : > { %1440 = vmatprep.subr.bf16.mxu0 %v2796_v58  ;;  %2497 = vmatpush3.bf16.msra.mxu1 %v2877_v45 }
  0xf9   : > { %2498 = vmatprep.subr.bf16.mxu1 %v2878_v46 }
  0xfb   : > { %1441 = vmatpush1.bf16.msra.mxu0 %v2794_v62  ;;  %v2887_v62 = vld [vmem:[#allocation6 + $0x30] sm:$0xff]  }
  0xfc   : > { %1442 = vmatprep.subr.bf16.mxu0 %v2801_v63  ;;  %2499 = vmatpush3.bf16.msra.mxu1 %v2879_v47  ;;  %v567_v63 = vshrl.u32 %v566_v60, 7  ;;  %v2899_v60 = vld [vmem:[#allocation7 + $0x8] sm:$0xff]  }
  0xff   : > { %1443 = vmatpush1.bf16.msra.mxu0 %v2799_v2  ;;  %v576_v2 = vsub.s32 2, %v567_v63 }
 0x100   : > { %1455 = vmatprep.subr.bf16.mxu0 %v2806_v3  ;;  %v564_v3 = vld [vmem:[%s3381_s2] sm:$0x7] }
 0x101   : > { %v577_v5 = vrot.slane %v564_v3, %v576_v2  ;;  %v2905_v2 = vld [vmem:[#allocation7 + $0x38] sm:$0xff]  }
 0x102   : > { %1445 = vmatmul.mubr.bf16.vlgmr.msra.gmra.mrb[0].mxu0 %v3309_v28  ;;  %v2852_v28 = vld [vmem:[#allocation4 + $0x3f0] ss:$12 sps:$4 sm:$0xff]  }
 0x103   : > { %1456 = vmatpush1.bf16.msra.mxu0 %v2804_v7  ;;  %1487 = vmatprep.mubr.bf16.mxu0 %v366_v48  ;;  %v2880_v48 = vld [vmem:[#allocation6 + $0x58] sm:$0xff]  }
 0x104   : > { %1457 = vmatprep.subr.bf16.mxu0 %v2811_v8  ;;  %2500 = vmatprep.subr.bf16.mxu1 %v2880_v48 }
 0x105   : > { %2501 = vmatpush3.bf16.msra.mxu1 %v2881_v49 }
 0x106   : > { %2502 = vmatprep.subr.bf16.mxu1 %v2882_v50 }
 0x107   : > { %1458 = vmatpush1.bf16.msra.mxu0 %v2809_v10 }
 0x108   : > { %1459 = vmatprep.subr.bf16.mxu0 %v2816_v11 }
 0x109   : > { %2503 = vmatpush3.bf16.msra.mxu1 %v2883_v51  ;;  %v2890_v51 = vld [vmem:[#allocation6 + $0x80] sm:$0xff]  }
 0x10a   : > { %2504 = vmatprep.subr.bf16.mxu1 %v2884_v52  ;;  %v2891_v52 = vld [vmem:[#allocation6 + $0x88] sm:$0xff]  }
 0x10b   : > { %1460 = vmatpush1.bf16.msra.mxu0 %v2814_v12 }
 0x10c   : > { %1461 = vmatprep.subr.bf16.mxu0 %v2821_v13 }
 0x10d   : > { %2505 = vmatpush3.bf16.msra.mxu1 %v2885_v53  ;;  %v2892_v53 = vld [vmem:[#allocation6 + $0x90] sm:$0xff]  }
 0x10e   : > { %2506 = vmatprep.subr.bf16.mxu1 %v2886_v61  ;;  %v2900_v61 = vld [vmem:[#allocation7 + $0x10] sm:$0xff]  }
 0x10f   : > { %1462 = vmatpush1.bf16.msra.mxu0 %v2819_v14 }
 0x110   : > { %1463 = vmatprep.subr.bf16.mxu0 %v2826_v15 }
 0x111   : > { %2507 = vmatpush3.bf16.msra.mxu1 %v2887_v62  ;;  %v2901_v62 = vld [vmem:[#allocation7 + $0x18] sm:$0xff]  }
 0x112   : > { %2508 = vmatprep.subr.bf16.mxu1 %v2888_v0  ;;  %v2903_v0 = vld [vmem:[#allocation7 + $0x28] sm:$0xff]  }
 0x113   : > { %1464 = vmatpush1.bf16.msra.mxu0 %v2824_v16 }
 0x114   : > { %1465 = vmatprep.subr.bf16.mxu0 %v2831_v17 }
 0x117   : > { %1466 = vmatpush1.bf16.msra.mxu0 %v2829_v18 }
 0x118   : > { %1467 = vmatprep.subr.bf16.mxu0 %v2836_v19 }
 0x11b   : > { %1468 = vmatpush1.bf16.msra.mxu0 %v2834_v20 }
 0x11c   : > { %1469 = vmatprep.subr.bf16.mxu0 %v2841_v21 }
 0x11f   : > { %1470 = vmatpush1.bf16.msra.mxu0 %v2839_v22 }
 0x120   : > { %1471 = vmatprep.subr.bf16.mxu0 %v2846_v23 }
 0x123   : > { %1472 = vmatpush1.bf16.msra.mxu0 %v2844_v24 }
 0x124   : > { %1473 = vmatprep.subr.bf16.mxu0 %v2851_v25 }
 0x127   : > { %1474 = vmatpush1.bf16.msra.mxu0 %v2849_v26 }
 0x128   : > { %1475 = vmatprep.subr.bf16.mxu0 %v2854_v27 }
 0x12b   : > { %1476 = vmatpush1.bf16.msra.mxu0 %v2852_v28 }
 0x12c   : > { %1477 = vmatprep.subr.bf16.mxu0 %v2858_v29 }
 0x12f   : > { %1478 = vmatpush1.bf16.msra.mxu0 %v2856_v30 }
 0x130   : > { %1479 = vmatprep.subr.bf16.mxu0 %v2861_v31 }
 0x133   : > { %1480 = vmatpush1.bf16.msra.mxu0 %v2859_v32 }
 0x134   : > { %1481 = vmatprep.subr.bf16.mxu0 %v2864_v33  ;;  %v568_v33 = vsub.s32 0, %v567_v63 }
 0x137   : > { %1482 = vmatpush1.bf16.msra.mxu0 %v2862_v34  ;;  %v572_v34 = vsub.s32 1, %v567_v63  ;;  %v2902_v63 = vld [vmem:[#allocation7 + $0x20] sm:$0xff]  }
 0x138   : > { %1483 = vmatprep.subr.bf16.mxu0 %v2867_v35  ;;  %v569_v35 = vrot.slane %v564_v3, %v568_v33 }
 0x13b   : > { %1484 = vmatpush1.bf16.msra.mxu0 %v2865_v36  ;;  %v573_v36 = vrot.slane %v564_v3, %v572_v34 }
 0x13c   : > { %1485 = vmatprep.subr.bf16.mxu0 %v2870_v37 }
 0x13f   : > { %1486 = vmatpush1.bf16.msra.mxu0 %v2868_v38 }
 0x140   : > { %1498 = vmatprep.subr.bf16.mxu0 %v2873_v39 }
 0x142   : > { %1488 = vmatmul.mubr.bf16.vlgmr.msra.gmra.mrb[0].mxu0 %v3316_v1  ;;  %v2889_v1 = vld [vmem:[#allocation6 + $0x38] sm:$0xff]  }
 0x143   : > { %1499 = vmatpush1.bf16.msra.mxu0 %v2871_v40  ;;  %1530 = vmatprep.mubr.bf16.mxu0 %v3076_v41 }
 0x144   : > { %2509 = vmatpush3.bf16.msra.mxu1 %v2889_v1  ;;  %v2904_v1 = vld [vmem:[#allocation7 + $0x30] sm:$0xff]  }
 0x145   : > { %2540 = vmatprep.subr.bf16.mxu1 %v3074_v4 }
 0x14e   : > { %2379 = vmatmul.mubr.msk.bf16.vlgmr.msra.gmra.mrb[0].mxu0 %vm1365_vm0, %v3324_v9 }
 0x17d   : > { %v2442_v54 = vpop.f32.mrb[0].mxu1 }
 0x17e   : > { %v2443_v55 = vpop.f32.mrb[1].mxu1 }
 0x17f   : > { %v2444_v56 = vadd.f32 %v2443_v55, %v2442_v54  ;;  %v2445_v57 = vpop.f32.mrb[2].mxu1  ;;  %v2893_v54 = vld [vmem:[#allocation6 + $0x98] sm:$0xff]   ;;  %v2894_v55 = vld [vmem:[#allocation6 + $0xa0] sm:$0xff]  }
 0x180   : > { %v2446_v58 = vpop.f32.mrb[3].mxu1 }
 0x181   : > { %v2447_v59 = vadd.f32 %v2446_v58, %v2445_v57  ;;  %v1576_v6 = vadd.f32 %v2444_v56, %v577_v5  ;;  %v2895_v56 = vld [vmem:[#allocation6 + $0xa8] sm:$0xff]   ;;  %v2896_v57 = vld [vmem:[#allocation6 + $0xb0] sm:$0xff]   ;;  %v2897_v58 = vld [vmem:[#allocation6 + $0xb8] sm:$0xff]  }
 0x183   : > { %v1579_v9 = vadd.f32 %v2447_v59, %v577_v5  ;;  %v2898_v59 = vld [vmem:[#allocation7] sm:$0xff]  }
 0x19e   : > { %v2464_v7 = vpop.f32.mrb[4].mxu1 }
 0x19f   : > { %v2465_v8 = vpop.f32.mrb[5].mxu1 }
 0x1a0   : > { %v2466_v10 = vadd.f32 %v2465_v8, %v2464_v7  ;;  %v2467_v11 = vpop.f32.mrb[6].mxu1 }
 0x1a1   : > { %v2468_v12 = vpop.f32.mrb[7].mxu1 }
 0x1a2   : > { %v1617_v13 = vadd.f32 %v2466_v10, %v1576_v6  ;;  %v2469_v14 = vadd.f32 %v2468_v12, %v2467_v11  ;;  %v2381_v10 = vld [vmem:[%s3383_s4] ss:$0 sm:$0xff] }
 0x1a4   : > { %v1620_v15 = vadd.f32 %v2469_v14, %v1579_v9 }
 0x1be   : > { %v2486_v16 = vpop.f32.mrb[8].mxu1 }
 0x1bf   : > { %v2487_v17 = vpop.f32.mrb[9].mxu1 }
 0x1c0   : > { %v2488_v18 = vadd.f32 %v2487_v17, %v2486_v16  ;;  %v2489_v19 = vpop.f32.mrb[10].mxu1 }
 0x1c1   : > { %v2490_v20 = vpop.f32.mrb[11].mxu1 }
 0x1c2   : > { %v2491_v21 = vadd.f32 %v2490_v20, %v2489_v19  ;;  %v1658_v22 = vadd.f32 %v2488_v18, %v1617_v13 }
 0x1c4   : > { %v1661_v23 = vadd.f32 %v2491_v21, %v1620_v15  ;;  %v2406_v21 = vld [vmem:[%s3385_s6] ss:$0 sm:$0xff] }
 0x1c6   : > { %v1698_v24 = vpop.f32.mrb[12].mxu1 }
 0x1c7   : > { %v1699_v25 = vadd.f32 %v1698_v24, %v1658_v22  ;;  %v2538_v26 = vpop.f32.mrb[13].mxu1 }
 0x1c8   : > { %v1701_v27 = vpop.f32.mrb[14].mxu1 }
 0x1c9   : > { %v1707_v28 = vmax.f32 %v1699_v25, 0.0  ;;  %v1702_v29 = vadd.f32 %v1701_v27, %v1661_v23  ;;  %v2539_v30 = vpop.f32.mrb[15].mxu1 }
 0x1cb   : > { %v1710_v31 = vmax.f32 %v1702_v29, 0.0 }
 0x1cd   : > { %v1713_v32 = vpack.c.bf16 %v1710_v31, %v1707_v28 }
 0x221   : > { %v1532_v37 = vpop.f32.mrb[0].mxu0 }
 0x222   : > { %v2580_v38 = vadd.f32 %v1532_v37, %v569_v35  ;;  %v1534_v39 = vpop.f32.mrb[1].mxu0 }
 0x223   : > { %v2581_v40 = vadd.f32 %v1534_v39, %v573_v36  ;;  %v1536_v41 = vpop.f32.mrb[2].mxu0 }
 0x224   : > { %v2582_v42 = vadd.f32 %v1536_v41, %v569_v35  ;;  %v1538_v43 = vpop.f32.mrb[3].mxu0  ;;  %v1705_v45 = vmax.f32 %v2580_v38, 0.0 }
 0x225   : > { %v2583_v44 = vadd.f32 %v1538_v43, %v573_v36  ;;  %v1706_v47 = vmax.f32 %v2581_v40, 0.0 }
 0x226   : > { %v1708_v46 = vmax.f32 %v2582_v42, 0.0 }
 0x227   : > { %v1709_v48 = vmax.f32 %v2583_v44, 0.0 }
 0x228   : > { %v1711_v49 = vpack.c.bf16 %v1708_v46, %v1705_v45 }
 0x229   : > { %v1712_v50 = vpack.c.bf16 %v1709_v48, %v1706_v47 }
 0x22b   : > { %1945 = vmatprep.mubr.bf16.mxu1 %v1712_v50 }
 0x22c   : > { %1946 = vmatmul.mubr.bf16.vlgmr.msra.gmra.mrb[16].mxu1 %v1711_v49 }
 0x22d   : > { %2541 = vmatpush3.bf16.msra.mxu1 %v2890_v51  ;;  %2556 = vmatprep.mubr.msk.bf16.mxu1 %vm3075_vm1, %v3074_v4 }
 0x22e   : > { %2542 = vmatprep.subr.bf16.mxu1 %v3074_v4 }
 0x231   : > { %2543 = vmatpush3.bf16.msra.mxu1 %v2891_v52 }
 0x232   : > { %2544 = vmatprep.subr.bf16.mxu1 %v3074_v4 }
 0x235   : > { %2545 = vmatpush3.bf16.msra.mxu1 %v2892_v53 }
 0x236   : > { %2546 = vmatprep.subr.bf16.mxu1 %v3074_v4 }
 0x239   : > { %2547 = vmatpush3.bf16.msra.mxu1 %v2893_v54 }
 0x23a   : > { %2548 = vmatprep.subr.bf16.mxu1 %v3074_v4 }
 0x23d   : > { %2549 = vmatpush3.bf16.msra.mxu1 %v2894_v55 }
 0x23e   : > { %2550 = vmatprep.subr.bf16.mxu1 %v3074_v4 }
 0x241   : > { %2551 = vmatpush3.bf16.msra.mxu1 %v2895_v56 }
 0x242   : > { %2552 = vmatprep.subr.bf16.mxu1 %v3074_v4 }
 0x245   : > { %2553 = vmatpush3.bf16.msra.mxu1 %v2896_v57 }
 0x246   : > { %2554 = vmatprep.subr.bf16.mxu1 %v3074_v4 }
 0x249   : > { %2555 = vmatpush3.bf16.msra.mxu1 %v2897_v58 }
 0x24a   : > { %2560 = vmatprep.subr.bf16.mxu1 %v3074_v4 }
 0x24c   : > { %2557 = vmatmul.mubr.bf16.vlgmr.msra.gmra.mrb[20].mxu1 %v1713_v32 }
 0x24d   : > { %2576 = vmatprep.mubr.msk.bf16.mxu1 %vm3075_vm1, %v3074_v4  ;;  %2561 = vmatpush3.bf16.msra.mxu1 %v2898_v59 }
 0x24e   : > { %2562 = vmatprep.subr.bf16.mxu1 %v3074_v4 }
 0x251   : > { %2563 = vmatpush3.bf16.msra.mxu1 %v2899_v60 }
 0x252   : > { %2564 = vmatprep.subr.bf16.mxu1 %v3074_v4 }
 0x255   : > { %2565 = vmatpush3.bf16.msra.mxu1 %v2900_v61 }
 0x256   : > { %2566 = vmatprep.subr.bf16.mxu1 %v3074_v4 }
 0x259   : > { %2567 = vmatpush3.bf16.msra.mxu1 %v2901_v62 }
 0x25a   : > { %2568 = vmatprep.subr.bf16.mxu1 %v3074_v4 }
 0x25d   : > { %2569 = vmatpush3.bf16.msra.mxu1 %v2902_v63 }
 0x25e   : > { %2570 = vmatprep.subr.bf16.mxu1 %v3074_v4 }
 0x261   : > { %2571 = vmatpush3.bf16.msra.mxu1 %v2903_v0 }
 0x262   : > { %2572 = vmatprep.subr.bf16.mxu1 %v3074_v4 }
 0x265   : > { %2573 = vmatpush3.bf16.msra.mxu1 %v2904_v1 }
 0x266   : > { %2574 = vmatprep.subr.bf16.mxu1 %v3074_v4 }
 0x269   : > { %2575 = vmatpush3.bf16.msra.mxu1 %v2905_v2 }
 0x2ff   : > { %v2510_v3 = vpop.f32.mrb[16].mxu1 }
 0x300   : > { %v2511_v5 = vpop.f32.mrb[17].mxu1 }
 0x301   : > { %v2512_v6 = vadd.f32 %v2511_v5, %v2510_v3  ;;  %v2513_v7 = vpop.f32.mrb[18].mxu1 }
 0x302   : > { %v2514_v8 = vpop.f32.mrb[19].mxu1 }
 0x303   : > { %v2515_v9 = vadd.f32 %v2514_v8, %v2513_v7  ;;  %v1948_v11 = vadd.f32 %v2512_v6, %v2381_v10 }
 0x305   : > { %v1951_v15 = vadd.f32 %v2515_v9, %v2381_v10 }
 0x31f   : > { %v1988_v12 = vpop.f32.mrb[20].mxu1 }
 0x320   : > { %v1989_v13 = vadd.f32 %v1988_v12, %v1948_v11  ;;  %v2558_v14 = vpop.f32.mrb[21].mxu1 }
 0x321   : > { %v1991_v16 = vpop.f32.mrb[22].mxu1 }
 0x322   : > { %v1992_v4 = vadd.f32 %v1991_v16, %v1951_v15  ;;  %v2559_v17 = vpop.f32.mrb[23].mxu1  ;;  %v1995_v18 = vmax.f32 %v1989_v13, 0.0 }
 0x324   : > { %v1996_v19 = vmax.f32 %v1992_v4, 0.0 }
 0x326   : > { %v1997_v20 = vpack.c.bf16 %v1996_v19, %v1995_v18 }
 0x328   : > { %2577 = vmatmul.mubr.bf16.vlgmr.msra.gmra.mrb[24].mxu1 %v1997_v20 }
 0x3fb   : > { %v2103_v22 = vpop.f32.mrb[24].mxu1 }
 0x3fc   : > { %v2578_v23 = vpop.f32.mrb[25].mxu1  ;;  %v2104_v25 = vadd.f32 %v2406_v21, %v2103_v22 }
 0x3fd   : > { %v2106_v24 = vpop.f32.mrb[26].mxu1 }
 0x3fe   : > { %v2107_v26 = vadd.f32 %v2406_v21, %v2106_v24  ;;  %v2579_v27 = vpop.f32.mrb[27].mxu1 }
 0x400   : > { %v2424_v28 = vpack.c.bf16 %v2107_v26, %v2104_v25 }
 0x402   : > { %2425 = vst [vmem:[%s344_s21] sm:$0xff] %v2424_v28  }
 0x403 PF: > { %p19_p6 = scmp.ge.s32.totalorder %s3213_s15, 4   ;;  %s3402_s24 = smov %s3054_s25 }
 0x404   : > { %s3403_s25 = smov %s3058_s26  ;;  %s3404_s26 = smov %s3241_s11 }
 0x405   : > { %s3405_s27 = smov %s3213_s15  ;;  %21 = sbr.rel (!%p19_p6) target bundleno = 5 (0x5), region = 100 }
 0x40c   :  { %2142 = vsyncpa [#allocation3], 1 }
 0x40d   :  { %2144 = vsyncpa [#allocation3 + $0x1], 1 }
 0x40e   :  { %2145 = vsyncpa [#allocation5], 1 }
 0x40f   :  { %2146 = vsyncpa [#allocation8], 1 }

</bundles_post_ra>
